<compile_context>
chip_gen: v6e
topology: v6e:2x2x1
jax: 0.10.0
libtpu: 0.0.40
codegen_flags: <defaults>
</compile_context>

<pallas_src>
import functools

import jax
import jax.numpy as jnp
from jax.experimental import pallas as pl
from jax.experimental.pallas import tpu as pltpu


def _round_up(x: int, m: int) -> int:
    return ((x + m - 1) // m) * m


def _pick_tile(dim: int, gran: int, cap: int):
    """Largest multiple of `gran` (<= cap) that divides round_up(dim, gran).

    Choosing a divisor of the rounded dimension means the padded extent equals
    the rounded extent -> minimal pad waste (no padding beyond alignment).
    """
    d = _round_up(dim, gran)
    limit = min(cap, d)
    best = gran
    t = gran
    while t <= limit:
        if d % t == 0:
            best = t
        t += gran
    return best, d


def ff_kernel(x_ref, w_ref, b_ref, o_ref, acc_ref):
    """One (tm, tn) output tile, reducing over the K grid axis (axis 2)."""
    k = pl.program_id(2)

    @pl.when(k == 0)
    def _init():
        acc_ref[...] = jnp.zeros_like(acc_ref)

    # bf16 [tm, tk] @ bf16 [tk, tn] on the MXU, f32 accumulation.
    acc_ref[...] += jnp.dot(
        x_ref[...], w_ref[...], preferred_element_type=jnp.float32
    )

    @pl.when(k == pl.num_programs(2) - 1)
    def _finalize():
        # Bias add (VPU) + tanh (EUP) exactly once per output tile, in f32.
        o_ref[...] = jnp.tanh(acc_ref[...] + b_ref[...]).astype(o_ref.dtype)


@functools.partial(
    jax.jit, static_argnames=("tm", "tn", "tk", "d_out", "compute_dtype")
)
def _ff_forward(x, w_t, b2d, *, tm, tn, tk, d_out, compute_dtype):
    """x: [B, d_in] (any float dtype); w_t: [K, N] pre-padded compute dtype;
    b2d: [1, N] f32.  Returns [B, d_out] in x.dtype."""
    B, d_in = x.shape
    K, N = w_t.shape
    cdt = jnp.dtype(compute_dtype)
    out_dtype = x.dtype

    # Per-call hot path only touches X: cast + pad to (M, K).
    M = _round_up(B, tm)
    x_c = x.astype(cdt)
    if (M, K) != (B, d_in):
        x_c = jnp.pad(x_c, ((0, M - B), (0, K - d_in)))

    grid = (N // tn, M // tm, K // tk)  # N leads -> dual-TC split lands on N.

    in_item = cdt.itemsize
    out_item = jnp.dtype(out_dtype).itemsize
    # Double-buffered X/W tiles + bias + double-buffered out tile + f32 acc.
    vmem_est = (
        2 * (tm * tk + tk * tn) * in_item
        + 2 * tn * 4
        + 2 * tm * tn * out_item
        + tm * tn * 4
    )
    vmem_limit = int(
        min(48 * 1024 * 1024, max(8 * 1024 * 1024, vmem_est + vmem_est // 2))
    )

    cost = pl.CostEstimate(
        flops=2 * B * d_in * d_out,
        transcendentals=B * d_out,
        bytes_accessed=(x.size + w_t.size) * in_item + (N + B * d_out) * 4,
    )

    y_p = pl.pallas_call(
        ff_kernel,
        out_shape=jax.ShapeDtypeStruct((M, N), out_dtype),
        grid_spec=pltpu.PrefetchScalarGridSpec(
            num_scalar_prefetch=0,
            grid=grid,
            in_specs=[
                pl.BlockSpec((tm, tk), lambda j, i, k: (i, k)),  # X tile
                pl.BlockSpec((tk, tn), lambda j, i, k: (k, j)),  # W^T tile
                pl.BlockSpec((1, tn), lambda j, i, k: (0, j)),   # bias (f32)
            ],
            out_specs=pl.BlockSpec((tm, tn), lambda j, i, k: (i, j)),
            scratch_shapes=[pltpu.VMEM((tm, tn), jnp.float32)],
        ),
        compiler_params=pltpu.CompilerParams(
            dimension_semantics=("parallel", "parallel", "arbitrary"),
            vmem_limit_bytes=vmem_limit,
        ),
        cost_estimate=cost,
    )(x_c, w_t, b2d)

    return y_p[:B, :d_out]


class PallasFF:
    """Pallas-TPU equivalent of the torch FF module: y = tanh(Linear(X)).

    Weight prep (dtype cast, transpose to [d_in, d_out], lane-dense padding)
    happens once here, mirroring parameter init, so the per-call path never
    re-pads or re-transposes W in HBM.
    """

    def __init__(self, w, b, *, compute_dtype=jnp.bfloat16,
                 max_tm=512, max_tn=1024, max_tk=2048):
        d_out, d_in = w.shape
        assert b.shape == (d_out,)
        self.d_in, self.d_out = d_in, d_out
        self.compute_dtype = jnp.dtype(compute_dtype)
        # bf16 packs 2 rows per sublane -> 16-row granularity; f32 -> 8.
        self.row_gran = 16 if self.compute_dtype.itemsize == 2 else 8
        self.max_tm = max_tm

        self.tn, self.N = _pick_tile(d_out, 128, max_tn)
        self.tk, self.K = _pick_tile(d_in, 128, max_tk)

        # One-time weight prep: cast -> transpose to [d_in, d_out] -> pad.
        w_t = jnp.asarray(w).astype(self.compute_dtype).T
        if (self.K, self.N) != (d_in, d_out):
            w_t = jnp.pad(w_t, ((0, self.K - d_in), (0, self.N - d_out)))
        self.w_t = w_t

        b_f32 = jnp.asarray(b).astype(jnp.float32)
        if self.N != d_out:
            b_f32 = jnp.pad(b_f32, (0, self.N - d_out))
        self.b2d = b_f32.reshape(1, self.N)

    def __call__(self, x):
        tm, _ = _pick_tile(x.shape[0], self.row_gran, self.max_tm)
        return _ff_forward(
            x, self.w_t, self.b2d,
            tm=tm, tn=self.tn, tk=self.tk, d_out=self.d_out,
            compute_dtype=self.compute_dtype.name,
        )


def _ref_forward(x, w, b, compute_dtype=jnp.bfloat16):
    """Reference matching the kernel's numerics (operands rounded to compute
    dtype, f32 accumulation, f32 bias+tanh)."""
    xc = x.astype(compute_dtype).astype(jnp.float32)
    wc = w.astype(compute_dtype).astype(jnp.float32)
    return jnp.tanh(xc @ wc.T + b.astype(jnp.float32))


if __name__ == "__main__":
    key = jax.random.PRNGKey(0)
    kx, kw, kb = jax.random.split(key, 3)

    # Small shapes matching the regression test's FF module.
    B, d_in, d_out = 8, 32, 16
    bound = 1.0 / (d_in ** 0.5)  # nn.Linear uniform(-1/sqrt(d_in), 1/sqrt(d_in))
    W = jax.random.uniform(kw, (d_out, d_in), jnp.float32, -bound, bound)
    bias = jax.random.uniform(kb, (d_out,), jnp.float32, -bound, bound)
    X = jax.random.normal(kx, (B, d_in), jnp.float32)

    ff = PallasFF(W, bias)  # bf16 MXU operands, f32 accumulation
    y = ff(X)
    jax.block_until_ready(y)

    assert y.shape == (B, d_out)
    assert jnp.allclose(y, _ref_forward(X, W, bias), atol=2e-3, rtol=2e-3)
    assert jnp.allclose(y, jnp.tanh(X @ W.T + bias), atol=3e-2, rtol=3e-2)

    # Larger check: exercises the multi-tile (N, M, K) grid and K-accumulator.
    kx2, kw2, kb2 = jax.random.split(jax.random.PRNGKey(1), 3)
    B2, d_in2, d_out2 = 768, 4096, 1280
    bound2 = 1.0 / (d_in2 ** 0.5)
    W2 = jax.random.uniform(kw2, (d_out2, d_in2), jnp.float32, -bound2, bound2)
    b2 = jax.random.uniform(kb2, (d_out2,), jnp.float32, -bound2, bound2)
    X2 = jax.random.normal(kx2, (B2, d_in2), jnp.float32)

    ff2 = PallasFF(W2, b2)
    y2 = ff2(X2)
    jax.block_until_ready(y2)
    assert y2.shape == (B2, d_out2)
    assert jnp.allclose(y2, _ref_forward(X2, W2, b2), atol=2e-3, rtol=2e-3)
    assert jnp.allclose(y2, jnp.tanh(X2 @ W2.T + b2), atol=3e-2, rtol=3e-2)

    print("KERNEL_OK")
</pallas_src>

<mosaic_0001>
module attributes {stable_mosaic.version = 11 : i64} {
  func.func @ff_kernel(%arg0: i32, %arg1: i32, %arg2: i32, %arg3: memref<16x128xbf16, #tpu.memory_space<vmem>>, %arg4: memref<128x128xbf16, #tpu.memory_space<vmem>>, %arg5: memref<1x128xf32, #tpu.memory_space<vmem>>, %arg6: memref<16x128xf32, #tpu.memory_space<vmem>>, %arg7: memref<16x128xf32, #tpu.memory_space<vmem>>) attributes {dimension_semantics = [#tpu.dimension_semantics<parallel>, #tpu.dimension_semantics<parallel>, #tpu.dimension_semantics<arbitrary>], iteration_bounds = array<i64: 1, 1, 1>, scalar_prefetch = 0 : i64, scratch_operands = 1 : i64, tpu.core_type = #tpu.core_type<tc>, window_params = [{transform_indices = @transform_0, window_bounds = array<i64: 16, 128>}, {transform_indices = @transform_1, window_bounds = array<i64: 128, 128>}, {transform_indices = @transform_2, window_bounds = array<i64: 1, 128>}, {transform_indices = @transform_3, window_bounds = array<i64: 16, 128>}]} {
    %c0_i32 = arith.constant 0 : i32
    %0 = arith.cmpi eq, %arg2, %c0_i32 : i32
    %1 = arith.extui %0 : i1 to i32
    %c0_i32_0 = arith.constant 0 : i32
    %2 = arith.cmpi ne, %1, %c0_i32_0 : i32
    scf.if %2 {
      %cst_10 = arith.constant 0.000000e+00 : f32
      %12 = vector.broadcast %cst_10 : f32 to vector<16x128xf32>
      %c0_11 = arith.constant 0 : index
      %c0_12 = arith.constant 0 : index
      %13 = vector.load %arg7[%c0_11, %c0_12] : memref<16x128xf32, #tpu.memory_space<vmem>>, vector<16x128xf32>
      tpu.vector_store %arg7[%c0_11, %c0_12], %12 {strides = array<i32>} : memref<16x128xf32, #tpu.memory_space<vmem>>, vector<16x128xf32>,
    } else {
    }
    %c0 = arith.constant 0 : index
    %c0_1 = arith.constant 0 : index
    %3 = vector.load %arg7[%c0, %c0_1] : memref<16x128xf32, #tpu.memory_space<vmem>>, vector<16x128xf32>
    %c0_2 = arith.constant 0 : index
    %c0_3 = arith.constant 0 : index
    %4 = vector.load %arg3[%c0_2, %c0_3] : memref<16x128xbf16, #tpu.memory_space<vmem>>, vector<16x128xbf16>
    %c0_4 = arith.constant 0 : index
    %c0_5 = arith.constant 0 : index
    %5 = vector.load %arg4[%c0_4, %c0_5] : memref<128x128xbf16, #tpu.memory_space<vmem>>, vector<128x128xbf16>
    %cst = arith.constant dense<0.000000e+00> : vector<16x128xf32>
    %6 = tpu.matmul %4, %5, %cst {dimension_numbers = #tpu.dot_dimension_numbers<[1], [0], [0], [1], [0, 0, 1, 1], [], []>} : vector<16x128xbf16>, vector<128x128xbf16>, vector<16x128xf32> -> vector<16x128xf32>
    %7 = arith.addf %3, %6 : vector<16x128xf32>
    %c0_6 = arith.constant 0 : index
    %c0_7 = arith.constant 0 : index
    %8 = vector.load %arg7[%c0_6, %c0_7] : memref<16x128xf32, #tpu.memory_space<vmem>>, vector<16x128xf32>
    tpu.vector_store %arg7[%c0_6, %c0_7], %7 {strides = array<i32>} : memref<16x128xf32, #tpu.memory_space<vmem>>, vector<16x128xf32>,
    %c0_i32_8 = arith.constant 0 : i32
    %9 = arith.cmpi eq, %arg2, %c0_i32_8 : i32
    %10 = arith.extui %9 : i1 to i32
    %c0_i32_9 = arith.constant 0 : i32
    %11 = arith.cmpi ne, %10, %c0_i32_9 : i32
    scf.if %11 {
      %c0_10 = arith.constant 0 : index
      %c0_11 = arith.constant 0 : index
      %12 = vector.load %arg7[%c0_10, %c0_11] : memref<16x128xf32, #tpu.memory_space<vmem>>, vector<16x128xf32>
      %c0_12 = arith.constant 0 : index
      %c0_13 = arith.constant 0 : index
      %13 = vector.load %arg5[%c0_12, %c0_13] : memref<1x128xf32, #tpu.memory_space<vmem>>, vector<1x128xf32>
      %14 = vector.broadcast %13 : vector<1x128xf32> to vector<16x128xf32>
      %15 = arith.addf %12, %14 : vector<16x128xf32>
      %16 = math.tanh %15 : vector<16x128xf32>
      %c0_14 = arith.constant 0 : index
      %c0_15 = arith.constant 0 : index
      %17 = vector.load %arg6[%c0_14, %c0_15] : memref<16x128xf32, #tpu.memory_space<vmem>>, vector<16x128xf32>
      tpu.vector_store %arg6[%c0_14, %c0_15], %16 {strides = array<i32>} : memref<16x128xf32, #tpu.memory_space<vmem>>, vector<16x128xf32>,
    } else {
    }
    return
  }
  func.func @transform_0(%arg0: i32, %arg1: i32, %arg2: i32) -> (i32, i32) {
    %c0_i32 = arith.constant 0 : i32
    return %arg1, %arg2 : i32, i32
  }
  func.func @transform_1(%arg0: i32, %arg1: i32, %arg2: i32) -> (i32, i32) {
    %c0_i32 = arith.constant 0 : i32
    return %arg2, %arg0 : i32, i32
  }
  func.func @transform_2(%arg0: i32, %arg1: i32, %arg2: i32) -> (i32, i32) {
    %c0_i32 = arith.constant 0 : i32
    %c0_i32_0 = arith.constant 0 : i32
    return %c0_i32, %arg0 : i32, i32
  }
  func.func @transform_3(%arg0: i32, %arg1: i32, %arg2: i32) -> (i32, i32) {
    %c0_i32 = arith.constant 0 : i32
    return %arg1, %arg0 : i32, i32
  }
}

</mosaic_0001>

<bundles_post_ra>
// kernel: _ff_forward.1
= control target key start
LH: loop header
LB: loop body
LE: loop exit
PB: predicated region body
PF: predicated region fallthrough
CT: control target
= control target key end

     0   :  { %8 = vsyncpa [#allocation4], 0  ;;  %s256_s12 = smov [#allocation3]   ;;  %s296_s0 = inlined_call_operand.vmem [shape: bf16[16,128], index: 0, kind: input, shape index: {}]   ;;  %s297_s1 = inlined_call_operand.hbm [shape: bf16[128,128], index: 1, kind: input, shape index: {}]   ;;  %s298_s2 = inlined_call_operand.vmem [shape: f32[1,128], index: 2, kind: input, shape index: {}]   ;;  %s299_s3 = inlined_call_operand.vmem [shape: f32[16,128], index: 3, kind: output, shape index: {}]  }
   0x1   :  { %s16_s13 = sshll.u32 %s256_s12, 4  ;;  %s17_s13 = int_to_ptr.vmem [resolvable:$true] %s16_s13 }
   0x2   :  { %s242_s14 = scalar_lea.vmem %s17_s13, 1024  ;;  %p247_p1 = scmp.lt.s32.totalorder %s17_s13, %s17_s13 }
   0x3   :  { %p243_p0 = scmp.ne.s32.totalorder %s17_s13, %s242_s14  ;;  %p248_p2 = scmp.lt.s32.totalorder %s242_s14, %s242_s14 }
   0x5   :  { %p249_p3 = por %p248_p2, %p247_p1 }
   0x7   :  { %p250_p4 = pnand %p249_p3, %p243_p0 }
   0x9   :  { %253 = shalt.err (!%p250_p4)
}
   0xa   :  { %s257_s15 = smov 64   ;;  %s258_s16 = smov 4  }
   0xb   :  { %22 = dma.hbm_to_vmem [thread:$0]  %s297_s1, 1024, %s17_s13, [#allocation4], %s257_s15, %s257_s15, %s258_s16  }
   0xc   :  { %254 = dma.done.wait [#allocation4], 1024  }
   0xd   :  { %255 = vsyncadd [#allocation4], 4294966272  ;;  %v259_v0 = vmov 0.0   ;;  %vm260_vm0 = vmmov 0   ;;  %v221_v1 = vld [vmem:[#allocation3 + $0x38] sm:$0xff]   ;;  %v222_v2 = vld [vmem:[#allocation3 + $0x30] sm:$0xff]  }
   0xe   :  { %196 = vmatprep.subr.bf16.mxu0 %v259_v0  ;;  %212 = vmatprep.mubr.msk.bf16.mxu0 %vm260_vm0, %v259_v0  ;;  %v223_v3 = vld [vmem:[#allocation3 + $0x28] sm:$0xff]   ;;  %v224_v4 = vld [vmem:[#allocation3 + $0x20] sm:$0xff]   ;;  %v225_v5 = vld [vmem:[#allocation3 + $0x18] sm:$0xff]  }
   0xf   :  { %197 = vmatpush3.bf16.msra.mxu0 %v221_v1  ;;  %v226_v6 = vld [vmem:[#allocation3 + $0x10] sm:$0xff]   ;;  %v227_v7 = vld [vmem:[#allocation3 + $0x8] sm:$0xff]   ;;  %v228_v8 = vld [vmem:[#allocation3] sm:$0xff]  }
  0x10   :  { %198 = vmatprep.subr.bf16.mxu0 %v259_v0  ;;  %v229_v9 = vld [vmem:[%s296_s0] sm:$0xff]  }
  0x11   :  { %v186_v10 = vld [vmem:[%s298_s2] ss:$0 sm:$0xff] }
  0x13   :  { %199 = vmatpush3.bf16.msra.mxu0 %v222_v2 }
  0x14   :  { %200 = vmatprep.subr.bf16.mxu0 %v259_v0 }
  0x17   :  { %201 = vmatpush3.bf16.msra.mxu0 %v223_v3 }
  0x18   :  { %202 = vmatprep.subr.bf16.mxu0 %v259_v0 }
  0x1b   :  { %203 = vmatpush3.bf16.msra.mxu0 %v224_v4 }
  0x1c   :  { %204 = vmatprep.subr.bf16.mxu0 %v259_v0 }
  0x1f   :  { %205 = vmatpush3.bf16.msra.mxu0 %v225_v5 }
  0x20   :  { %206 = vmatprep.subr.bf16.mxu0 %v259_v0 }
  0x23   :  { %207 = vmatpush3.bf16.msra.mxu0 %v226_v6 }
  0x24   :  { %208 = vmatprep.subr.bf16.mxu0 %v259_v0 }
  0x27   :  { %209 = vmatpush3.bf16.msra.mxu0 %v227_v7 }
  0x28   :  { %210 = vmatprep.subr.bf16.mxu0 %v259_v0 }
  0x2b   :  { %211 = vmatpush3.bf16.msra.mxu0 %v228_v8 }
  0x2e   :  { %213 = vmatmul.mubr.bf16.vlgmr.msra.gmra.mxu0 %v229_v9 }
  0xee   :  { %v143_v11 = vpop.f32.mrf.mxu0 }
  0xef   :  { %v166_v12 = vadd.f32 %v186_v10, %v143_v11 }
  0xf0   :  { %v214_v13 = vpop.f32.mrf.mxu0 }
  0xf1   :  { %230 = vtanh.f32 %v166_v12 }
  0xf2   :  { %v146_v14 = vpop.f32.mrf.mxu0 }
  0xf3   :  { %v167_v15 = vadd.f32 %v186_v10, %v146_v14 }
  0xf4   :  { %v215_v16 = vpop.f32.mrf.mxu0 }
  0xf5   :  { %232 = vtanh.f32 %v167_v15 }
  0xfe   :  { %v231_v17 = vpop.eup %230 }
  0xff   :  { %170 = vst [vmem:[%s299_s3] sm:$0xff] %v231_v17 }
 0x102   :  { %v233_v18 = vpop.eup %232 }
 0x103   :  { %171 = vst [vmem:[%s299_s3 + $0x8] sm:$0xff] %v233_v18 }
 0x104   :  { %176 = vsyncpa [#allocation4], 1 }

</bundles_post_ra>
